<compile_context>
chip_gen: v7x
topology: tpu7x:2x2x1
jax: 0.10.0
libtpu: 0.0.40
codegen_flags: <defaults>
</compile_context>

<pallas_src>
import functools

import jax
import jax.numpy as jnp
from jax import lax
from jax.experimental import pallas as pl
from jax.experimental.pallas import tpu as pltpu

EPS = 1e-5  # PyTorch nn.LayerNorm default eps


def _layernorm(x, g, b):
    mu = jnp.mean(x, axis=-1, keepdims=True)
    var = jnp.mean(jnp.square(x - mu), axis=-1, keepdims=True)
    return (x - mu) * lax.rsqrt(var + EPS) * g + b


def _gelu_exact(x):
    # PyTorch nn.GELU() default: exact erf-based GELU
    return 0.5 * x * (1.0 + lax.erf(x * 0.7071067811865476))


# ----------------------------------------------------------------------------
# Kernel 1: LayerNorm + Linear  (to_q / to_k / to_v), tiled over tokens
# ----------------------------------------------------------------------------
def ln_linear_kernel(x_ref, g_ref, b_ref, w_ref, bias_ref, o_ref):
    x = x_ref[...].astype(jnp.float32)                         # (TM, D)
    xn = _layernorm(x, g_ref[...], b_ref[...])                 # (TM, D) f32
    y = jnp.dot(xn.astype(w_ref.dtype), w_ref[...],            # bf16 x bf16 -> f32
                preferred_element_type=jnp.float32) + bias_ref[...]
    o_ref[...] = y.astype(o_ref.dtype)


def ln_linear(x, g, b, w, bias, *, out_dtype, tm=1024):
    M, D = x.shape
    Dout = w.shape[1]
    tm = M if M <= tm else tm                                  # tm=1024 is a mult of 8
    grid = (pl.cdiv(M, tm),)
    return pl.pallas_call(
        ln_linear_kernel,
        out_shape=jax.ShapeDtypeStruct((M, Dout), out_dtype),
        grid=grid,
        in_specs=[
            pl.BlockSpec((tm, D), lambda i: (i, 0)),
            pl.BlockSpec((1, D), lambda i: (0, 0)),
            pl.BlockSpec((1, D), lambda i: (0, 0)),
            pl.BlockSpec((D, Dout), lambda i: (0, 0)),         # weights resident
            pl.BlockSpec((1, Dout), lambda i: (0, 0)),
        ],
        out_specs=pl.BlockSpec((tm, Dout), lambda i: (i, 0)),
        compiler_params=pltpu.CompilerParams(dimension_semantics=("parallel",)),
    )(
        x,
        g.reshape(1, -1).astype(jnp.float32),
        b.reshape(1, -1).astype(jnp.float32),
        w.astype(jnp.bfloat16),
        bias.reshape(1, -1).astype(jnp.float32),
    )


# ----------------------------------------------------------------------------
# Kernel 2: cross-attention core.
#   grid = (batch, Q-tiles, cameras); cameras (reduction for the softmax) is the
#   innermost "arbitrary" axis and is folded in with an online softmax.
#   Heads are handled inside the kernel (static unrolled loop writing per-head
#   scratch slices in place -- no concatenation); output is lane-dense (TQ, H*dh).
# ----------------------------------------------------------------------------
def attn_kernel(q_ref, k_ref, v_ref, o_ref, m_s, l_s, acc_s, *, heads, dh):
    ci = pl.program_id(2)

    @pl.when(ci == 0)
    def _():
        m_s[...] = jnp.full(m_s.shape, -jnp.inf, jnp.float32)
        l_s[...] = jnp.zeros(l_s.shape, jnp.float32)
        acc_s[...] = jnp.zeros(acc_s.shape, jnp.float32)

    # softmax scale is already folded into the to_q weights.
    q = q_ref[...].astype(jnp.bfloat16)      # (TQ, heads*dh)
    k = k_ref[...].astype(jnp.bfloat16)      # (K,  heads*dh)
    v = v_ref[...].astype(jnp.bfloat16)      # (K,  heads*dh)

    for h in range(heads):                   # static unroll; per-head 2D MXU dots
        sl = slice(h * dh, (h + 1) * dh)
        # s = q_h @ k_h^T  (contract last dims; no explicit transpose needed)
        s = lax.dot_general(q[:, sl], k[:, sl],
                            (((1,), (1,)), ((), ())),
                            preferred_element_type=jnp.float32)      # (TQ, K)
        m_prev = m_s[h]                                              # (TQ, 1)
        m_new = jnp.maximum(m_prev, jnp.max(s, axis=-1, keepdims=True))
        alpha = jnp.exp(m_prev - m_new)                              # (TQ, 1)
        p = jnp.exp(s - m_new)                                       # (TQ, K)
        l_s[h] = alpha * l_s[h] + jnp.sum(p, axis=-1, keepdims=True)
        acc_s[h] = alpha * acc_s[h] + jnp.dot(
            p.astype(jnp.bfloat16), v[:, sl], preferred_element_type=jnp.float32)
        m_s[h] = m_new

    @pl.when(ci == pl.num_programs(2) - 1)
    def _():
        for h in range(heads):
            inv_l = pl.reciprocal(l_s[h], approx=True)               # (TQ, 1) EUP
            o_ref[:, h * dh:(h + 1) * dh] = (acc_s[h] * inv_l).astype(o_ref.dtype)


def attention(q_p, k_p, v_p, *, heads, dh, tq=256):
    b, n, Q, HD = q_p.shape
    K = k_p.shape[2]
    tq = Q if Q <= tq else tq
    nq = pl.cdiv(Q, tq)
    kern = functools.partial(attn_kernel, heads=heads, dh=dh)
    return pl.pallas_call(
        kern,
        out_shape=jax.ShapeDtypeStruct((b, Q, HD), jnp.bfloat16),
        grid=(b, nq, n),
        in_specs=[
            pl.BlockSpec((None, None, tq, HD), lambda bi, qi, ci: (bi, ci, qi, 0)),
            pl.BlockSpec((None, None, K, HD), lambda bi, qi, ci: (bi, ci, 0, 0)),
            pl.BlockSpec((None, None, K, HD), lambda bi, qi, ci: (bi, ci, 0, 0)),
        ],
        out_specs=pl.BlockSpec((None, tq, HD), lambda bi, qi, ci: (bi, qi, 0)),
        scratch_shapes=[
            pltpu.VMEM((heads, tq, 1), jnp.float32),   # running max
            pltpu.VMEM((heads, tq, 1), jnp.float32),   # running sum
            pltpu.VMEM((heads, tq, dh), jnp.float32),  # output accumulator
        ],
        compiler_params=pltpu.CompilerParams(
            dimension_semantics=("parallel", "parallel", "arbitrary")),
    )(q_p, k_p, v_p)


# ----------------------------------------------------------------------------
# Kernel 3: proj + skip + prenorm + MLP(GELU) residual + postnorm, Q-tiled
# ----------------------------------------------------------------------------
def out_kernel(a_ref, skip_ref, wp_ref, bp_ref, gpre_ref, bpre_ref,
               w1_ref, b1_ref, w2_ref, b2_ref, gpost_ref, bpost_ref, o_ref):
    a = a_ref[...].astype(wp_ref.dtype)                                  # (TQ, HD) bf16
    z = jnp.dot(a, wp_ref[...], preferred_element_type=jnp.float32) + bp_ref[...]
    z = z + skip_ref[...].astype(jnp.float32)
    z = _layernorm(z, gpre_ref[...], bpre_ref[...])
    h = jnp.dot(z.astype(w1_ref.dtype), w1_ref[...],
                preferred_element_type=jnp.float32) + b1_ref[...]
    h = _gelu_exact(h)
    z2 = jnp.dot(h.astype(w2_ref.dtype), w2_ref[...],
                 preferred_element_type=jnp.float32) + b2_ref[...]
    z = z + z2
    z = _layernorm(z, gpost_ref[...], bpost_ref[...])
    o_ref[...] = z.astype(o_ref.dtype)


def output_stage(a, skip_t, p, *, tq=512):
    B, Q, HD = a.shape
    D = p["proj_w"].shape[1]
    D2 = p["mlp_w1"].shape[1]
    tq = Q if Q <= tq else tq
    nq = pl.cdiv(Q, tq)
    f32, bf16 = jnp.float32, jnp.bfloat16
    return pl.pallas_call(
        out_kernel,
        out_shape=jax.ShapeDtypeStruct((B, Q, D), f32),
        grid=(B, nq),
        in_specs=[
            pl.BlockSpec((None, tq, HD), lambda bi, qi: (bi, qi, 0)),
            pl.BlockSpec((None, tq, D), lambda bi, qi: (bi, qi, 0)),
            pl.BlockSpec((HD, D), lambda bi, qi: (0, 0)),
            pl.BlockSpec((1, D), lambda bi, qi: (0, 0)),
            pl.BlockSpec((1, D), lambda bi, qi: (0, 0)),
            pl.BlockSpec((1, D), lambda bi, qi: (0, 0)),
            pl.BlockSpec((D, D2), lambda bi, qi: (0, 0)),
            pl.BlockSpec((1, D2), lambda bi, qi: (0, 0)),
            pl.BlockSpec((D2, D), lambda bi, qi: (0, 0)),
            pl.BlockSpec((1, D), lambda bi, qi: (0, 0)),
            pl.BlockSpec((1, D), lambda bi, qi: (0, 0)),
            pl.BlockSpec((1, D), lambda bi, qi: (0, 0)),
        ],
        out_specs=pl.BlockSpec((None, tq, D), lambda bi, qi: (bi, qi, 0)),
        compiler_params=pltpu.CompilerParams(
            dimension_semantics=("parallel", "parallel")),
    )(
        a, skip_t,
        p["proj_w"].astype(bf16), p["proj_b"].reshape(1, -1).astype(f32),
        p["pre_g"].reshape(1, -1).astype(f32), p["pre_b"].reshape(1, -1).astype(f32),
        p["mlp_w1"].astype(bf16), p["mlp_b1"].reshape(1, -1).astype(f32),
        p["mlp_w2"].astype(bf16), p["mlp_b2"].reshape(1, -1).astype(f32),
        p["post_g"].reshape(1, -1).astype(f32), p["post_b"].reshape(1, -1).astype(f32),
    )


# ----------------------------------------------------------------------------
# Full forward (wrapper glue = minimal channel-first <-> tokens-last transposes)
# ----------------------------------------------------------------------------
def cross_attention_forward(params, q, k, v, skip=None):
    b, n, d, H, W = q.shape
    _, _, _, h, w = k.shape
    Q, K = H * W, h * w
    heads, dh = params["heads"], params["dim_head"]
    HD = heads * dh
    scale = float(dh) ** (-0.5)

    # b n d H W -> (b n seq, d)   (tokens-last-feature layout)
    q_t = jnp.transpose(q, (0, 1, 3, 4, 2)).reshape(b * n * Q, d)
    k_t = jnp.transpose(k, (0, 1, 3, 4, 2)).reshape(b * n * K, d)
    v_t = jnp.transpose(v, (0, 1, 3, 4, 2)).reshape(b * n * K, d)

    # Fold the softmax scale into the query projection (once, on the tiny weights).
    q_w = params["q_w"] * scale
    q_b = params["q_b"] * scale

    bf16 = jnp.bfloat16
    q_p = ln_linear(q_t, params["q_ln_g"], params["q_ln_b"], q_w, q_b, out_dtype=bf16)
    k_p = ln_linear(k_t, params["k_ln_g"], params["k_ln_b"], params["k_w"], params["k_b"],
                    out_dtype=bf16)
    v_p = ln_linear(v_t, params["v_ln_g"], params["v_ln_b"], params["v_w"], params["v_b"],
                    out_dtype=bf16)

    # Free reshapes only (no head split/merge transposes): heads fused in-kernel.
    q_p = q_p.reshape(b, n, Q, HD)
    k_p = k_p.reshape(b, n, K, HD)
    v_p = v_p.reshape(b, n, K, HD)

    a = attention(q_p, k_p, v_p, heads=heads, dh=dh)            # (b, Q, HD) bf16

    if skip is None:
        skip_t = jnp.zeros((b, Q, d), jnp.float32)
    else:
        skip_t = jnp.transpose(skip, (0, 2, 3, 1)).reshape(b, Q, d).astype(jnp.float32)

    z = output_stage(a, skip_t, params)                         # (b, Q, d) f32

    # 'b (H W) d -> b d H W'
    return jnp.transpose(z.reshape(b, H, W, d), (0, 3, 1, 2)).astype(q.dtype)


# ----------------------------------------------------------------------------
# Pure-JAX f32 reference (same math, no Pallas) used as correctness check
# ----------------------------------------------------------------------------
def reference_forward(params, q, k, v, skip=None):
    b, n, d, H, W = q.shape
    _, _, _, h, w = k.shape
    Q, K = H * W, h * w
    heads, dh = params["heads"], params["dim_head"]
    scale = float(dh) ** (-0.5)

    def ln_lin(x, g, beta, wmat, bias):
        return _layernorm(x, g, beta) @ wmat + bias

    q_t = jnp.transpose(q, (0, 1, 3, 4, 2)).reshape(b, n, Q, d)
    k_t = jnp.transpose(k, (0, 1, 3, 4, 2)).reshape(b, n, K, d)
    v_t = jnp.transpose(v, (0, 1, 3, 4, 2)).reshape(b, n, K, d)

    qp = ln_lin(q_t, params["q_ln_g"], params["q_ln_b"], params["q_w"], params["q_b"])
    kp = ln_lin(k_t, params["k_ln_g"], params["k_ln_b"], params["k_w"], params["k_b"])
    vp = ln_lin(v_t, params["v_ln_g"], params["v_ln_b"], params["v_w"], params["v_b"])

    qh = qp.reshape(b, n, Q, heads, dh).transpose(0, 3, 1, 2, 4).reshape(b * heads, n, Q, dh)
    kh = kp.reshape(b, n, K, heads, dh).transpose(0, 3, 1, 2, 4).reshape(b * heads, n, K, dh)
    vh = vp.reshape(b, n, K, heads, dh).transpose(0, 3, 1, 2, 4).reshape(b * heads, n * K, dh)

    dot = scale * jnp.einsum('bnqd,bnkd->bnqk', qh, kh)
    dot = dot.transpose(0, 2, 1, 3).reshape(b * heads, Q, n * K)
    att = jax.nn.softmax(dot, axis=-1)
    a = jnp.einsum('bqk,bkd->bqd', att, vh)
    a = a.reshape(b, heads, Q, dh).transpose(0, 2, 1, 3).reshape(b, Q, heads * dh)

    z = a @ params["proj_w"] + params["proj_b"]
    if skip is not None:
        z = z + jnp.transpose(skip, (0, 2, 3, 1)).reshape(b, Q, d)
    z = _layernorm(z, params["pre_g"], params["pre_b"])
    hdn = _gelu_exact(z @ params["mlp_w1"] + params["mlp_b1"])
    z = z + (hdn @ params["mlp_w2"] + params["mlp_b2"])
    z = _layernorm(z, params["post_g"], params["post_b"])
    return jnp.transpose(z.reshape(b, H, W, d), (0, 3, 1, 2))


# ----------------------------------------------------------------------------
# Deterministic parameter init
# ----------------------------------------------------------------------------
def init_params(key, dim, heads, dim_head):
    ks = jax.random.split(key, 24)
    dqkv = heads * dim_head

    def lin(kw, kb, din, dout):
        wmat = 0.02 * jax.random.normal(kw, (din, dout), jnp.float32)
        bvec = 0.02 * jax.random.normal(kb, (dout,), jnp.float32)
        return wmat, bvec

    def ln(kg, kb, dfeat):
        g = 1.0 + 0.05 * jax.random.normal(kg, (dfeat,), jnp.float32)
        beta = 0.05 * jax.random.normal(kb, (dfeat,), jnp.float32)
        return g, beta

    p = {"heads": heads, "dim_head": dim_head}
    p["q_ln_g"], p["q_ln_b"] = ln(ks[0], ks[1], dim)
    p["q_w"], p["q_b"] = lin(ks[2], ks[3], dim, dqkv)
    p["k_ln_g"], p["k_ln_b"] = ln(ks[4], ks[5], dim)
    p["k_w"], p["k_b"] = lin(ks[6], ks[7], dim, dqkv)
    p["v_ln_g"], p["v_ln_b"] = ln(ks[8], ks[9], dim)
    p["v_w"], p["v_b"] = lin(ks[10], ks[11], dim, dqkv)
    p["proj_w"], p["proj_b"] = lin(ks[12], ks[13], dqkv, dim)
    p["pre_g"], p["pre_b"] = ln(ks[14], ks[15], dim)
    p["mlp_w1"], p["mlp_b1"] = lin(ks[16], ks[17], dim, 2 * dim)
    p["mlp_w2"], p["mlp_b2"] = lin(ks[18], ks[19], 2 * dim, dim)
    p["post_g"], p["post_b"] = ln(ks[20], ks[21], dim)
    return p


if __name__ == "__main__":
    # small shapes: batch=2, cameras n=2, dim=32, heads=4, dim_head=8,
    # query grid H=W=4 (Q=16), key grid h=w=4 (K=16)
    b, n, dim, heads, dim_head = 2, 2, 32, 4, 8
    H = W = 4
    h = w = 4

    key = jax.random.PRNGKey(0)
    kp, kq, kk, kv, ks = jax.random.split(key, 5)
    params = init_params(kp, dim, heads, dim_head)

    q = jax.random.normal(kq, (b, n, dim, H, W), jnp.float32)
    k = jax.random.normal(kk, (b, n, dim, h, w), jnp.float32)
    v = jax.random.normal(kv, (b, n, dim, h, w), jnp.float32)
    skip = jax.random.normal(ks, (b, dim, H, W), jnp.float32)

    out = cross_attention_forward(params, q, k, v, skip)
    out = jax.block_until_ready(out)

    ref = jax.block_until_ready(reference_forward(params, q, k, v, skip))
    assert out.shape == (b, dim, H, W)
    # bf16 MXU operands + approx reciprocal -> compare against the f32 reference
    # with a bf16-appropriate tolerance.
    assert jnp.allclose(out, ref, atol=2e-2, rtol=2e-2), "mismatch vs reference"

    print("KERNEL_OK")
</pallas_src>

<mosaic_0001>
module attributes {stable_mosaic.version = 11 : i64} {
  func.func @ln_linear_kernel(%arg0: i32, %arg1: memref<64x32xf32, #tpu.memory_space<vmem>>, %arg2: memref<1x32xf32, #tpu.memory_space<vmem>>, %arg3: memref<1x32xf32, #tpu.memory_space<vmem>>, %arg4: memref<32x32xbf16, #tpu.memory_space<vmem>>, %arg5: memref<1x32xf32, #tpu.memory_space<vmem>>, %arg6: memref<64x32xbf16, #tpu.memory_space<vmem>>) attributes {dimension_semantics = [#tpu.dimension_semantics<parallel>], iteration_bounds = array<i64: 1>, scalar_prefetch = 0 : i64, scratch_operands = 0 : i64, tpu.core_type = #tpu.core_type<tc>, window_params = [{transform_indices = @transform_0, window_bounds = array<i64: 64, 32>}, {pipeline_mode = #tpu.pipeline_mode<synchronous>, transform_indices = @transform_1, window_bounds = array<i64: 1, 32>}, {pipeline_mode = #tpu.pipeline_mode<synchronous>, transform_indices = @transform_2, window_bounds = array<i64: 1, 32>}, {pipeline_mode = #tpu.pipeline_mode<synchronous>, transform_indices = @transform_3, window_bounds = array<i64: 32, 32>}, {pipeline_mode = #tpu.pipeline_mode<synchronous>, transform_indices = @transform_4, window_bounds = array<i64: 1, 32>}, {transform_indices = @transform_5, window_bounds = array<i64: 64, 32>}]} {
    %c0 = arith.constant 0 : index
    %c0_0 = arith.constant 0 : index
    %0 = vector.load %arg1[%c0, %c0_0] : memref<64x32xf32, #tpu.memory_space<vmem>>, vector<64x32xf32>
    %c0_1 = arith.constant 0 : index
    %c0_2 = arith.constant 0 : index
    %1 = vector.load %arg2[%c0_1, %c0_2] : memref<1x32xf32, #tpu.memory_space<vmem>>, vector<1x32xf32>
    %c0_3 = arith.constant 0 : index
    %c0_4 = arith.constant 0 : index
    %2 = vector.load %arg3[%c0_3, %c0_4] : memref<1x32xf32, #tpu.memory_space<vmem>>, vector<1x32xf32>
    %cst = arith.constant dense<0.000000e+00> : vector<64xf32>
    %3 = vector.multi_reduction <add>, %0, %cst [1] : vector<64x32xf32> to vector<64xf32>
    %4 = vector.shape_cast %3 : vector<64xf32> to vector<64x1xf32>
    %cst_5 = arith.constant 3.200000e+01 : f32
    %5 = vector.broadcast %cst_5 : f32 to vector<64x1xf32>
    %6 = arith.divf %4, %5 : vector<64x1xf32>
    %7 = vector.broadcast %6 : vector<64x1xf32> to vector<64x32xf32>
    %8 = arith.subf %0, %7 : vector<64x32xf32>
    %9 = arith.mulf %8, %8 : vector<64x32xf32>
    %cst_6 = arith.constant dense<0.000000e+00> : vector<64xf32>
    %10 = vector.multi_reduction <add>, %9, %cst_6 [1] : vector<64x32xf32> to vector<64xf32>
    %11 = vector.shape_cast %10 : vector<64xf32> to vector<64x1xf32>
    %cst_7 = arith.constant 3.200000e+01 : f32
    %12 = vector.broadcast %cst_7 : f32 to vector<64x1xf32>
    %13 = arith.divf %11, %12 : vector<64x1xf32>
    %14 = vector.broadcast %6 : vector<64x1xf32> to vector<64x32xf32>
    %15 = arith.subf %0, %14 : vector<64x32xf32>
    %cst_8 = arith.constant 9.99999974E-6 : f32
    %16 = vector.broadcast %cst_8 : f32 to vector<64x1xf32>
    %17 = arith.addf %13, %16 : vector<64x1xf32>
    %18 = math.rsqrt %17 : vector<64x1xf32>
    %19 = vector.broadcast %18 : vector<64x1xf32> to vector<64x32xf32>
    %20 = arith.mulf %15, %19 : vector<64x32xf32>
    %21 = vector.broadcast %1 : vector<1x32xf32> to vector<64x32xf32>
    %22 = arith.mulf %20, %21 : vector<64x32xf32>
    %23 = vector.broadcast %2 : vector<1x32xf32> to vector<64x32xf32>
    %24 = arith.addf %22, %23 : vector<64x32xf32>
    %25 = arith.truncf %24 : vector<64x32xf32> to vector<64x32xbf16>
    %c0_9 = arith.constant 0 : index
    %c0_10 = arith.constant 0 : index
    %26 = vector.load %arg4[%c0_9, %c0_10] : memref<32x32xbf16, #tpu.memory_space<vmem>>, vector<32x32xbf16>
    %cst_11 = arith.constant dense<0.000000e+00> : vector<64x32xf32>
    %27 = tpu.matmul %25, %26, %cst_11 {dimension_numbers = #tpu.dot_dimension_numbers<[1], [0], [0], [1], [0, 0, 1, 1], [], []>} : vector<64x32xbf16>, vector<32x32xbf16>, vector<64x32xf32> -> vector<64x32xf32>
    %c0_12 = arith.constant 0 : index
    %c0_13 = arith.constant 0 : index
    %28 = vector.load %arg5[%c0_12, %c0_13] : memref<1x32xf32, #tpu.memory_space<vmem>>, vector<1x32xf32>
    %29 = vector.broadcast %28 : vector<1x32xf32> to vector<64x32xf32>
    %30 = arith.addf %27, %29 : vector<64x32xf32>
    %31 = arith.truncf %30 : vector<64x32xf32> to vector<64x32xbf16>
    %c0_14 = arith.constant 0 : index
    %c0_15 = arith.constant 0 : index
    %32 = vector.load %arg6[%c0_14, %c0_15] : memref<64x32xbf16, #tpu.memory_space<vmem>>, vector<64x32xbf16>
    tpu.vector_store %arg6[%c0_14, %c0_15], %31 {strides = array<i32>} : memref<64x32xbf16, #tpu.memory_space<vmem>>, vector<64x32xbf16>,
    return
  }
  func.func @transform_0(%arg0: i32) -> (i32, i32) {
    %c0_i32 = arith.constant 0 : i32
    %c0_i32_0 = arith.constant 0 : i32
    return %arg0, %c0_i32 : i32, i32
  }
  func.func @transform_1(%arg0: i32) -> (i32, i32) {
    %c0_i32 = arith.constant 0 : i32
    %c0_i32_0 = arith.constant 0 : i32
    %c0_i32_1 = arith.constant 0 : i32
    return %c0_i32, %c0_i32_0 : i32, i32
  }
  func.func @transform_2(%arg0: i32) -> (i32, i32) {
    %c0_i32 = arith.constant 0 : i32
    %c0_i32_0 = arith.constant 0 : i32
    %c0_i32_1 = arith.constant 0 : i32
    return %c0_i32, %c0_i32_0 : i32, i32
  }
  func.func @transform_3(%arg0: i32) -> (i32, i32) {
    %c0_i32 = arith.constant 0 : i32
    %c0_i32_0 = arith.constant 0 : i32
    %c0_i32_1 = arith.constant 0 : i32
    return %c0_i32, %c0_i32_0 : i32, i32
  }
  func.func @transform_4(%arg0: i32) -> (i32, i32) {
    %c0_i32 = arith.constant 0 : i32
    %c0_i32_0 = arith.constant 0 : i32
    %c0_i32_1 = arith.constant 0 : i32
    return %c0_i32, %c0_i32_0 : i32, i32
  }
  func.func @transform_5(%arg0: i32) -> (i32, i32) {
    %c0_i32 = arith.constant 0 : i32
    %c0_i32_0 = arith.constant 0 : i32
    return %arg0, %c0_i32 : i32, i32
  }
}

</mosaic_0001>

<bundles_post_ra>
// kernel: tpu_custom_call.1
= control target key start
LH: loop header
LB: loop body
LE: loop exit
PB: predicated region body
PF: predicated region fallthrough
CT: control target
= control target key end

     0   :  { %vm31_vm0 = vcmask 261120   ;;  %vm301_vm1 = vcmask 257024   ;;  %s540_s0 = inlined_call_operand.vmem [shape: f32[64,32], index: 0, kind: input, shape index: {}]   ;;  %s541_s3 = inlined_call_operand.vmem [shape: bf16[32,32], index: 3, kind: input, shape index: {}]   ;;  %s542_s1 = inlined_call_operand.vmem [shape: f32[1,32], index: 1, kind: input, shape index: {}]   ;;  %s543_s2 = inlined_call_operand.vmem [shape: f32[1,32], index: 2, kind: input, shape index: {}]   ;;  %s544_s4 = inlined_call_operand.vmem [shape: f32[1,32], index: 4, kind: input, shape index: {}]   ;;  %s545_s5 = inlined_call_operand.vmem [shape: bf16[64,32], index: 5, kind: output, shape index: {}]  }
   0x1   :  { %v21_v0 = vld [vmem:[%s540_s0] sm:$0xff]  ;;  %v22_v2 = vld [vmem:[%s540_s0 + $0x8] sm:$0xff]  ;;  %v23_v8 = vld [vmem:[%s540_s0 + $0x10] sm:$0xff] }
   0x2   :  { %v25_v1 = vld [vmem:[%s540_s0 + $0x20] sm:$0xff]  ;;  %v32_v3 = vsel %vm31_vm0, %v21_v0, 0.0  ;;  %v26_v5 = vld [vmem:[%s540_s0 + $0x28] sm:$0xff]  ;;  %v35_v6 = vsel %vm31_vm0, %v22_v2, 0.0  ;;  %v24_v9 = vld [vmem:[%s540_s0 + $0x18] sm:$0xff]  ;;  %v38_v10 = vsel %vm31_vm0, %v23_v8, 0.0 }
   0x3   :  { %v44_v4 = vsel %vm31_vm0, %v25_v1, 0.0  ;;  %33 = vadd.xlane.f32.xlu0 %v32_v3  ;;  %v47_v7 = vsel %vm31_vm0, %v26_v5, 0.0  ;;  %v41_v11 = vsel %vm31_vm0, %v24_v9, 0.0  ;;  %v27_v12 = vld [vmem:[%s540_s0 + $0x30] sm:$0xff]  ;;  %v28_v13 = vld [vmem:[%s540_s0 + $0x38] sm:$0xff]  ;;  %v361_v56 = vld [vmem:[%s541_s3] sm:$0xff]  }
   0x4   :  { %45 = vadd.xlane.f32.xlu1 %v44_v4  ;;  %v50_v14 = vsel %vm31_vm0, %v27_v12, 0.0  ;;  %v53_v15 = vsel %vm31_vm0, %v28_v13, 0.0  ;;  %345 = vmatprep.subr.bf16.mxu0 %v361_v56  ;;  %v362_v57 = vld [vmem:[%s541_s3 + $0x8] sm:$0xff]  }
   0x5   :  { %357 = vmatprep.subr.bf16.mxu1 %v361_v56  ;;  %346 = vmatpush3.bf16.msra.mxu0 %v361_v56 }
   0x6   :  { %359 = vmatpush3.bf16.msra.mxu1 %v361_v56  ;;  %347 = vmatprep.subr.bf16.mxu0 %v362_v57 }
   0x7   :  { %36 = vadd.xlane.f32.xlu0 %v35_v6  ;;  %358 = vmatprep.subr.bf16.mxu1 %v362_v57 }
   0x8   :  { %48 = vadd.xlane.f32.xlu1 %v47_v7 }
   0x9   :  { %348 = vmatpush3.bf16.msra.mxu0 %v362_v57 }
   0xa   :  { %360 = vmatpush3.bf16.msra.mxu1 %v362_v57 }
   0xb   :  { %39 = vadd.xlane.f32.xlu0 %v38_v10 }
   0xc   :  { %42 = vadd.xlane.f32.xlu1 %v41_v11 }
   0xf   :  { %51 = vadd.xlane.f32.xlu0 %v50_v14 }
  0x10   :  { %54 = vadd.xlane.f32.xlu1 %v53_v15 }
  0x90   :  { %v34_v16 = vpop.xlane.xlu0 %33 }
  0x91   :  { %v46_v17 = vpop.xlane.xlu1 %45  ;;  %v57_v18 = vmul.f32 0.03125, %v34_v16 }
  0x92   :  { %v61_v19 = vmul.f32 0.03125, %v46_v17 }
  0x93   :  { %v441_v20 = vsub.f32 %v21_v0, %v57_v18 }
  0x94   :  { %v443_v21 = vsub.f32 %v25_v1, %v61_v19  ;;  %v37_v22 = vpop.xlane.xlu0 %36  ;;  %v314_v19 = vld [vmem:[%s542_s1] ss:$0 sm:$0xff] }
  0x95   :  { %v49_v23 = vpop.xlane.xlu1 %48  ;;  %v58_v24 = vmul.f32 0.03125, %v37_v22  ;;  %v73_v26 = vmul.f32 %v441_v20, %v441_v20 }
  0x96   :  { %v62_v25 = vmul.f32 0.03125, %v49_v23  ;;  %v77_v27 = vmul.f32 %v443_v21, %v443_v21 }
  0x97   :  { %v449_v28 = vsub.f32 %v22_v2, %v58_v24  ;;  %v81_v30 = vsel %vm31_vm0, %v73_v26, 0.0 }
  0x98   :  { %v451_v29 = vsub.f32 %v26_v5, %v62_v25  ;;  %82 = vadd.xlane.f32.xlu0 %v81_v30  ;;  %v40_v31 = vpop.xlane.xlu0 %39  ;;  %v93_v33 = vsel %vm31_vm0, %v77_v27, 0.0  ;;  %v315_v27 = vld [vmem:[%s543_s2] ss:$0 sm:$0xff] }
  0x99   :  { %v43_v32 = vpop.xlane.xlu1 %42  ;;  %v59_v34 = vmul.f32 0.03125, %v40_v31  ;;  %v74_v36 = vmul.f32 %v449_v28, %v449_v28 }
  0x9a   :  { %v60_v35 = vmul.f32 0.03125, %v43_v32  ;;  %v78_v37 = vmul.f32 %v451_v29, %v451_v29 }
  0x9b   :  { %v459_v38 = vsub.f32 %v23_v8, %v59_v34  ;;  %v84_v40 = vsel %vm31_vm0, %v74_v36, 0.0 }
  0x9c   :  { %v461_v39 = vsub.f32 %v24_v9, %v60_v35  ;;  %94 = vadd.xlane.f32.xlu0 %v93_v33  ;;  %85 = vadd.xlane.f32.xlu1 %v84_v40  ;;  %v52_v41 = vpop.xlane.xlu0 %51  ;;  %v96_v43 = vsel %vm31_vm0, %v78_v37, 0.0 }
  0x9d   :  { %v55_v42 = vpop.xlane.xlu1 %54  ;;  %v63_v44 = vmul.f32 0.03125, %v52_v41  ;;  %v75_v46 = vmul.f32 %v459_v38, %v459_v38 }
  0x9e   :  { %v64_v45 = vmul.f32 0.03125, %v55_v42  ;;  %v76_v47 = vmul.f32 %v461_v39, %v461_v39 }
  0x9f   :  { %v469_v48 = vsub.f32 %v27_v12, %v63_v44  ;;  %v87_v50 = vsel %vm31_vm0, %v75_v46, 0.0 }
  0xa0   :  { %v471_v49 = vsub.f32 %v28_v13, %v64_v45  ;;  %97 = vadd.xlane.f32.xlu1 %v96_v43  ;;  %88 = vadd.xlane.f32.xlu0 %v87_v50  ;;  %v90_v51 = vsel %vm31_vm0, %v76_v47, 0.0 }
  0xa1   :  { %v79_v52 = vmul.f32 %v469_v48, %v469_v48 }
  0xa2   :  { %v80_v53 = vmul.f32 %v471_v49, %v471_v49 }
  0xa3   :  { %v99_v54 = vsel %vm31_vm0, %v79_v52, 0.0 }
  0xa4   :  { %91 = vadd.xlane.f32.xlu1 %v90_v51  ;;  %100 = vadd.xlane.f32.xlu0 %v99_v54  ;;  %v102_v55 = vsel %vm31_vm0, %v80_v53, 0.0 }
  0xa8   :  { %103 = vadd.xlane.f32.xlu1 %v102_v55 }
 0x125   :  { %v83_v58 = vpop.xlane.xlu0 %82 }
 0x126   :  { %v105_v59 = vmul.f32 0.03125, %v83_v58 }
 0x128   :  { %v113_v60 = vadd.f32 1e-05, %v105_v59 }
 0x129   :  { %v86_v61 = vpop.xlane.xlu1 %85  ;;  %v95_v62 = vpop.xlane.xlu0 %94 }
 0x12a   :  { %363 = vrsqrt.f32 %v113_v60  ;;  %v106_v63 = vmul.f32 0.03125, %v86_v61  ;;  %v109_v0 = vmul.f32 0.03125, %v95_v62 }
 0x12c   :  { %v114_v1 = vadd.f32 1e-05, %v106_v63  ;;  %v117_v2 = vadd.f32 1e-05, %v109_v0 }
 0x12d   :  { %v98_v3 = vpop.xlane.xlu1 %97  ;;  %v89_v4 = vpop.xlane.xlu0 %88 }
 0x12e   :  { %365 = vrsqrt.f32 %v114_v1  ;;  %v110_v5 = vmul.f32 0.03125, %v98_v3  ;;  %v107_v6 = vmul.f32 0.03125, %v89_v4 }
 0x12f   :  { %367 = vrsqrt.f32 %v117_v2 }
 0x130   :  { %v118_v7 = vadd.f32 1e-05, %v110_v5  ;;  %v115_v8 = vadd.f32 1e-05, %v107_v6 }
 0x131   :  { %v92_v9 = vpop.xlane.xlu1 %91  ;;  %v101_v10 = vpop.xlane.xlu0 %100 }
 0x132   :  { %369 = vrsqrt.f32 %v118_v7  ;;  %v108_v11 = vmul.f32 0.03125, %v92_v9  ;;  %v111_v12 = vmul.f32 0.03125, %v101_v10 }
 0x133   :  { %371 = vrsqrt.f32 %v115_v8 }
 0x134   :  { %v364_v13 = vpop.eup %363  ;;  %v116_v14 = vadd.f32 1e-05, %v108_v11  ;;  %v119_v15 = vadd.f32 1e-05, %v111_v12 }
 0x135   :  { %v104_v16 = vpop.xlane.xlu1 %103  ;;  %v129_v17 = vmul.f32 %v364_v13, %v441_v20 }
 0x136   :  { %373 = vrsqrt.f32 %v116_v14  ;;  %v112_v18 = vmul.f32 0.03125, %v104_v16 }
 0x137   :  { %375 = vrsqrt.f32 %v119_v15  ;;  %v143_v26 = vmul.f32 %v314_v19, %v129_v17 }
 0x138   :  { %v366_v22 = vpop.eup %365  ;;  %v120_v23 = vadd.f32 1e-05, %v112_v18 }
 0x139   :  { %v368_v24 = vpop.eup %367  ;;  %v130_v25 = vmul.f32 %v366_v22, %v449_v28  ;;  %v157_v33 = vadd.f32 %v315_v27, %v143_v26 }
 0x13a   :  { %377 = vrsqrt.f32 %v120_v23  ;;  %v133_v20 = vmul.f32 %v368_v24, %v443_v21 }
 0x13b   :  { %v144_v30 = vmul.f32 %v314_v19, %v130_v25 }
 0x13c   :  { %v370_v31 = vpop.eup %369  ;;  %v147_v36 = vmul.f32 %v314_v19, %v133_v20 }
 0x13d   :  { %v372_v32 = vpop.eup %371  ;;  %v158_v34 = vadd.f32 %v315_v27, %v144_v30  ;;  %v134_v35 = vmul.f32 %v370_v31, %v451_v29 }
 0x13e   :  { %v131_v37 = vmul.f32 %v372_v32, %v459_v38  ;;  %v161_v44 = vadd.f32 %v315_v27, %v147_v36 }
 0x13f   :  { %v165_v40 = vpack.c.bf16 %v158_v34, %v157_v33  ;;  %v148_v28 = vmul.f32 %v314_v19, %v134_v35 }
 0x140   :  { %v374_v41 = vpop.eup %373  ;;  %v145_v45 = vmul.f32 %v314_v19, %v131_v37 }
 0x141   :  { %v376_v42 = vpop.eup %375  ;;  %v132_v43 = vmul.f32 %v374_v41, %v461_v39  ;;  %349 = vmatprep.mubr.msk.bf16.mxu0 %vm31_vm0, %v165_v40  ;;  %v162_v21 = vadd.f32 %v315_v27, %v148_v28 }
 0x142   :  { %v135_v46 = vmul.f32 %v376_v42, %v469_v48  ;;  %v159_v38 = vadd.f32 %v315_v27, %v145_v45  ;;  %v316_v48 = vld [vmem:[%s544_s4] ss:$0 sm:$0xff] }
 0x143   :  { %v167_v47 = vpack.c.bf16 %v162_v21, %v161_v44  ;;  %v146_v50 = vmul.f32 %v314_v19, %v132_v43 }
 0x144   :  { %v378_v51 = vpop.eup %377  ;;  %v149_v53 = vmul.f32 %v314_v19, %v135_v46 }
 0x145   :  { %v136_v29 = vmul.f32 %v378_v51, %v471_v49  ;;  %353 = vmatprep.mubr.msk.bf16.mxu1 %vm31_vm0, %v167_v47  ;;  %v160_v52 = vadd.f32 %v315_v27, %v146_v50 }
 0x146   :  { %v163_v39 = vadd.f32 %v315_v27, %v149_v53 }
 0x147   :  { %v166_v54 = vpack.c.bf16 %v160_v52, %v159_v38  ;;  %v150_v55 = vmul.f32 %v314_v19, %v136_v29 }
 0x149   :  { %350 = vmatmul.mubr.msk.bf16.vlgmr.msra.gmra.mrb[0].mxu0 %vm31_vm0, %v166_v54  ;;  %v164_v56 = vadd.f32 %v315_v27, %v150_v55 }
 0x14b   :  { %v168_v57 = vpack.c.bf16 %v164_v56, %v163_v39 }
 0x14d   :  { %354 = vmatmul.mubr.msk.bf16.vlgmr.msra.gmra.mrb[0].mxu1 %vm31_vm0, %v168_v57 }
 0x21c   :  { %v351_v58 = vpop.f32.mrb[0].mxu0 }
 0x21d   :  { %v247_v49 = vadd.f32 %v351_v58, %v316_v48  ;;  %v238_v59 = vpop.f32.mrb[1].mxu0 }
 0x21e   :  { %v239_v60 = vadd.f32 %v316_v48, %v238_v59  ;;  %v352_v61 = vpop.f32.mrb[2].mxu0 }
 0x21f   :  { %v333_v62 = vpack.c.bf16 %v247_v49, %v247_v49  ;;  %v250_v63 = vadd.f32 %v352_v61, %v316_v48  ;;  %v241_v0 = vpop.f32.mrb[3].mxu0 }
 0x220   :  { %v331_v1 = vpack.c.bf16 %v239_v60, %v239_v60  ;;  %v242_v2 = vadd.f32 %v316_v48, %v241_v0  ;;  %v355_v3 = vpop.f32.mrb[0].mxu1 }
 0x221   :  { %304 = vst.msk [vmem:[%s545_s5 + $0x8] sm:$0xf] %vm301_vm1, %v333_v62  ;;  %v334_v4 = vpack.c.bf16 %v250_v63, %v250_v63  ;;  %v263_v5 = vadd.f32 %v355_v3, %v316_v48  ;;  %v254_v6 = vpop.f32.mrb[1].mxu1 }
 0x222   :  { %302 = vst.msk [vmem:[%s545_s5] sm:$0xf] %vm301_vm1, %v331_v1  ;;  %v332_v7 = vpack.c.bf16 %v242_v2, %v242_v2  ;;  %v255_v8 = vadd.f32 %v316_v48, %v254_v6  ;;  %v356_v9 = vpop.f32.mrb[2].mxu1 }
 0x223   :  { %305 = vst.msk [vmem:[%s545_s5 + $0xc] sm:$0xf] %vm301_vm1, %v334_v4  ;;  %v337_v10 = vpack.c.bf16 %v263_v5, %v263_v5  ;;  %v266_v11 = vadd.f32 %v356_v9, %v316_v48  ;;  %v257_v12 = vpop.f32.mrb[3].mxu1 }
 0x224   :  { %303 = vst.msk [vmem:[%s545_s5 + $0x4] sm:$0xf] %vm301_vm1, %v332_v7  ;;  %v335_v13 = vpack.c.bf16 %v255_v8, %v255_v8  ;;  %v258_v14 = vadd.f32 %v316_v48, %v257_v12 }
 0x225   :  { %308 = vst.msk [vmem:[%s545_s5 + $0x18] sm:$0xf] %vm301_vm1, %v337_v10  ;;  %v338_v15 = vpack.c.bf16 %v266_v11, %v266_v11 }
 0x226   :  { %306 = vst.msk [vmem:[%s545_s5 + $0x10] sm:$0xf] %vm301_vm1, %v335_v13  ;;  %v336_v16 = vpack.c.bf16 %v258_v14, %v258_v14 }
 0x227   :  { %309 = vst.msk [vmem:[%s545_s5 + $0x1c] sm:$0xf] %vm301_vm1, %v338_v15 }
 0x228   :  { %307 = vst.msk [vmem:[%s545_s5 + $0x14] sm:$0xf] %vm301_vm1, %v336_v16 }

</bundles_post_ra>
